<compile_context>
chip_gen: v5e
topology: v5e:2x2
jax: 0.10.0
libtpu: 0.0.40
codegen_flags: <defaults>
</compile_context>

<pallas_src>
import jax
import jax.numpy as jnp
from jax.experimental import pallas as pl
from jax.experimental.pallas import tpu as pltpu

# ---------------- configuration (mirrors VAEConfig defaults) ----------------
LATENT_SIZE = 5
HIDDEN_SIZES = (25, 10, 5)[::-1]   # Decoder reverses -> (5, 10, 25)
X_DIM = 32                         # reconstructed feature dimension
BATCH = 64                         # demo batch
BATCH_TILE = 32                    # rows per grid step (multiple of 8)

PAD = 128                          # lane width: every layer dim padded to 128
N_LAYERS = 4                       # 3 hidden Linear+ReLU + 1 output Linear
SLAB_ROWS = N_LAYERS * PAD + 8     # 4 weight blocks (128 rows each) + bias block (8 rows)


def decoder_kernel(z_ref, p_ref, out_ref):
    """Full decoder for one batch tile: 3x(Linear+ReLU) -> Linear -> sigmoid.

    z_ref:   (BATCH_TILE, 128)  latent, zero-padded past column LATENT_SIZE
    p_ref:   (520, 128)         packed parameter slab (resident across grid)
    out_ref: (BATCH_TILE, 128)  sigmoid output, columns >= X_DIM are garbage (0.5)

    Dropout layers are identity (inference semantics).
    Zero padding propagates exactly: padded weight rows/cols are 0, padded
    bias lanes are 0, and ReLU(0) = 0, so padded activation lanes stay 0.
    """
    h = z_ref[...]                                    # (T, 128) f32
    biases = p_ref[N_LAYERS * PAD:N_LAYERS * PAD + 8, :]   # (8, 128); rows 0..3 used

    for i in range(N_LAYERS):
        w = p_ref[i * PAD:(i + 1) * PAD, :]           # (128, 128) static aligned slice
        b = biases[i:i + 1, :]                        # (1, 128)
        h = jnp.dot(h, w, preferred_element_type=jnp.float32) + b
        if i < N_LAYERS - 1:
            h = jnp.maximum(h, 0.0)                   # ReLU (hidden layers only)

    # Exact sigmoid via tanh (single EUP op, no inf intermediate, no approx error).
    out_ref[...] = 0.5 * (jnp.tanh(0.5 * h) + 1.0)


def pack_params(params):
    """Pack [(w, b)] * 4 into one (520, 128) f32 slab.

    Weight i (in_i, out_i) -> rows [i*128, i*128+in_i), cols [0, out_i).
    Bias   i (1, out_i)    -> row  4*128 + i,           cols [0, out_i).
    Everything else is zero (padding is semantically inert, see kernel docstring).
    """
    slab = jnp.zeros((SLAB_ROWS, PAD), jnp.float32)
    for i, (w, b) in enumerate(params):
        fi, fo = w.shape
        slab = slab.at[i * PAD:i * PAD + fi, :fo].set(w)
        slab = slab.at[N_LAYERS * PAD + i, :fo].set(b.reshape(-1))
    return slab


def decoder_forward(z, param_slab, x_dim=X_DIM, batch_tile=BATCH_TILE):
    """z: (B, latent) f32, param_slab: (520, 128) f32 -> x_hat: (B, x_dim) f32."""
    B, latent = z.shape
    num_tiles = (B + batch_tile - 1) // batch_tile
    b_pad = num_tiles * batch_tile

    # Lane-dense, sublane-aligned input: (B_pad, 128) with zero padding.
    z_p = jnp.zeros((b_pad, PAD), jnp.float32).at[:B, :latent].set(z)

    out = pl.pallas_call(
        decoder_kernel,
        out_shape=jax.ShapeDtypeStruct((b_pad, PAD), jnp.float32),
        grid_spec=pltpu.PrefetchScalarGridSpec(
            num_scalar_prefetch=0,
            grid=(num_tiles,),
            in_specs=[
                # batch tiles stream through the pipeline
                pl.BlockSpec((batch_tile, PAD), lambda i: (i, 0)),
                # single packed parameter slab, same block every step -> VMEM-resident
                pl.BlockSpec((SLAB_ROWS, PAD), lambda i: (0, 0)),
            ],
            out_specs=pl.BlockSpec((batch_tile, PAD), lambda i: (i, 0)),
        ),
        compiler_params=pltpu.CompilerParams(
            dimension_semantics=("arbitrary",)),   # tiny kernel: keep on one TC
    )(z_p, param_slab)

    return out[:B, :x_dim]


def init_params(key):
    """Deterministic init. Weights stored (in, out); biases (1, out).

    Matches PyTorch Linear semantics: y = x @ W + b with W == W_torch.T.
    """
    sizes = [LATENT_SIZE] + list(HIDDEN_SIZES) + [X_DIM]
    params = []
    for i in range(len(sizes) - 1):
        fan_in, fan_out = sizes[i], sizes[i + 1]
        key, kw, kb = jax.random.split(key, 3)
        bound = 1.0 / jnp.sqrt(fan_in)
        w = jax.random.uniform(kw, (fan_in, fan_out), jnp.float32, -bound, bound)
        b = jax.random.uniform(kb, (1, fan_out), jnp.float32, -bound, bound)
        params.append((w, b))
    return params


def decoder_reference(z, params):
    """Pure-JAX reference (full-precision matmuls) for correctness checking."""
    hp = jax.lax.Precision.HIGHEST
    h = z
    for (w, b) in params[:-1]:
        h = jnp.maximum(jnp.dot(h, w, precision=hp) + b, 0.0)
    wo, bo = params[-1]
    return jax.nn.sigmoid(jnp.dot(h, wo, precision=hp) + bo)


if __name__ == "__main__":
    key = jax.random.PRNGKey(0)
    key, kz = jax.random.split(key)
    z = jax.random.normal(kz, (BATCH, LATENT_SIZE), jnp.float32)
    params = init_params(key)

    # Pack once, outside the hot path (weights are reused across calls).
    param_slab = pack_params(params)

    x_hat = decoder_forward(z, param_slab)
    x_hat = jax.block_until_ready(x_hat)

    ref = decoder_reference(z, params)
    assert x_hat.shape == (BATCH, X_DIM)
    # Both paths are full-f32; 2e-3 leaves headroom for MXU f32 multi-pass rounding.
    assert jnp.allclose(x_hat, ref, atol=2e-3, rtol=2e-3), "mismatch vs reference"

    print("KERNEL_OK")
</pallas_src>

<mosaic_0001>
module attributes {stable_mosaic.version = 11 : i64} {
  func.func @decoder_kernel(%arg0: i32, %arg1: memref<32x128xf32, #tpu.memory_space<vmem>>, %arg2: memref<520x128xf32, #tpu.memory_space<vmem>>, %arg3: memref<32x128xf32, #tpu.memory_space<vmem>>) attributes {dimension_semantics = [#tpu.dimension_semantics<arbitrary>], iteration_bounds = array<i64: 2>, scalar_prefetch = 0 : i64, scratch_operands = 0 : i64, tpu.core_type = #tpu.core_type<tc>, window_params = [{transform_indices = @transform_0, window_bounds = array<i64: 32, 128>}, {pipeline_mode = #tpu.pipeline_mode<synchronous>, transform_indices = @transform_1, window_bounds = array<i64: 520, 128>}, {transform_indices = @transform_2, window_bounds = array<i64: 32, 128>}]} {
    %c0 = arith.constant 0 : index
    %c0_0 = arith.constant 0 : index
    %0 = vector.load %arg1[%c0, %c0_0] : memref<32x128xf32, #tpu.memory_space<vmem>>, vector<32x128xf32>
    %c512 = arith.constant 512 : index
    %c0_1 = arith.constant 0 : index
    %1 = vector.load %arg2[%c512, %c0_1] : memref<520x128xf32, #tpu.memory_space<vmem>>, vector<8x128xf32>
    %c0_2 = arith.constant 0 : index
    %c0_3 = arith.constant 0 : index
    %2 = vector.load %arg2[%c0_2, %c0_3] : memref<520x128xf32, #tpu.memory_space<vmem>>, vector<128x128xf32>
    %3 = vector.extract_strided_slice %1 {offsets = [0, 0], sizes = [1, 128], strides = [1, 1]} : vector<8x128xf32> to vector<1x128xf32>
    %cst = arith.constant dense<0.000000e+00> : vector<32x128xf32>
    %4 = tpu.matmul %0, %2, %cst {dimension_numbers = #tpu.dot_dimension_numbers<[1], [0], [0], [1], [0, 0, 1, 1], [], []>} : vector<32x128xf32>, vector<128x128xf32>, vector<32x128xf32> -> vector<32x128xf32>
    %5 = vector.broadcast %3 : vector<1x128xf32> to vector<32x128xf32>
    %6 = arith.addf %4, %5 : vector<32x128xf32>
    %cst_4 = arith.constant 0.000000e+00 : f32
    %7 = vector.broadcast %cst_4 : f32 to vector<32x128xf32>
    %8 = arith.maximumf %6, %7 : vector<32x128xf32>
    %c128 = arith.constant 128 : index
    %c0_5 = arith.constant 0 : index
    %9 = vector.load %arg2[%c128, %c0_5] : memref<520x128xf32, #tpu.memory_space<vmem>>, vector<128x128xf32>
    %10 = vector.extract_strided_slice %1 {offsets = [1, 0], sizes = [1, 128], strides = [1, 1]} : vector<8x128xf32> to vector<1x128xf32>
    %cst_6 = arith.constant dense<0.000000e+00> : vector<32x128xf32>
    %11 = tpu.matmul %8, %9, %cst_6 {dimension_numbers = #tpu.dot_dimension_numbers<[1], [0], [0], [1], [0, 0, 1, 1], [], []>} : vector<32x128xf32>, vector<128x128xf32>, vector<32x128xf32> -> vector<32x128xf32>
    %12 = vector.broadcast %10 : vector<1x128xf32> to vector<32x128xf32>
    %13 = arith.addf %11, %12 : vector<32x128xf32>
    %cst_7 = arith.constant 0.000000e+00 : f32
    %14 = vector.broadcast %cst_7 : f32 to vector<32x128xf32>
    %15 = arith.maximumf %13, %14 : vector<32x128xf32>
    %c256 = arith.constant 256 : index
    %c0_8 = arith.constant 0 : index
    %16 = vector.load %arg2[%c256, %c0_8] : memref<520x128xf32, #tpu.memory_space<vmem>>, vector<128x128xf32>
    %17 = vector.extract_strided_slice %1 {offsets = [2, 0], sizes = [1, 128], strides = [1, 1]} : vector<8x128xf32> to vector<1x128xf32>
    %cst_9 = arith.constant dense<0.000000e+00> : vector<32x128xf32>
    %18 = tpu.matmul %15, %16, %cst_9 {dimension_numbers = #tpu.dot_dimension_numbers<[1], [0], [0], [1], [0, 0, 1, 1], [], []>} : vector<32x128xf32>, vector<128x128xf32>, vector<32x128xf32> -> vector<32x128xf32>
    %19 = vector.broadcast %17 : vector<1x128xf32> to vector<32x128xf32>
    %20 = arith.addf %18, %19 : vector<32x128xf32>
    %cst_10 = arith.constant 0.000000e+00 : f32
    %21 = vector.broadcast %cst_10 : f32 to vector<32x128xf32>
    %22 = arith.maximumf %20, %21 : vector<32x128xf32>
    %c384 = arith.constant 384 : index
    %c0_11 = arith.constant 0 : index
    %23 = vector.load %arg2[%c384, %c0_11] : memref<520x128xf32, #tpu.memory_space<vmem>>, vector<128x128xf32>
    %24 = vector.extract_strided_slice %1 {offsets = [3, 0], sizes = [1, 128], strides = [1, 1]} : vector<8x128xf32> to vector<1x128xf32>
    %cst_12 = arith.constant dense<0.000000e+00> : vector<32x128xf32>
    %25 = tpu.matmul %22, %23, %cst_12 {dimension_numbers = #tpu.dot_dimension_numbers<[1], [0], [0], [1], [0, 0, 1, 1], [], []>} : vector<32x128xf32>, vector<128x128xf32>, vector<32x128xf32> -> vector<32x128xf32>
    %26 = vector.broadcast %24 : vector<1x128xf32> to vector<32x128xf32>
    %27 = arith.addf %25, %26 : vector<32x128xf32>
    %cst_13 = arith.constant 5.000000e-01 : f32
    %28 = vector.broadcast %cst_13 : f32 to vector<32x128xf32>
    %29 = arith.mulf %28, %27 : vector<32x128xf32>
    %30 = math.tanh %29 : vector<32x128xf32>
    %cst_14 = arith.constant 1.000000e+00 : f32
    %31 = vector.broadcast %cst_14 : f32 to vector<32x128xf32>
    %32 = arith.addf %30, %31 : vector<32x128xf32>
    %cst_15 = arith.constant 5.000000e-01 : f32
    %33 = vector.broadcast %cst_15 : f32 to vector<32x128xf32>
    %34 = arith.mulf %33, %32 : vector<32x128xf32>
    %c0_16 = arith.constant 0 : index
    %c0_17 = arith.constant 0 : index
    %35 = vector.load %arg3[%c0_16, %c0_17] : memref<32x128xf32, #tpu.memory_space<vmem>>, vector<32x128xf32>
    tpu.vector_store %arg3[%c0_16, %c0_17], %34 {strides = array<i32>} : memref<32x128xf32, #tpu.memory_space<vmem>>, vector<32x128xf32>,
    return
  }
  func.func @transform_0(%arg0: i32) -> (i32, i32) {
    %c0_i32 = arith.constant 0 : i32
    %c0_i32_0 = arith.constant 0 : i32
    return %arg0, %c0_i32 : i32, i32
  }
  func.func @transform_1(%arg0: i32) -> (i32, i32) {
    %c0_i32 = arith.constant 0 : i32
    %c0_i32_0 = arith.constant 0 : i32
    %c0_i32_1 = arith.constant 0 : i32
    return %c0_i32, %c0_i32_0 : i32, i32
  }
  func.func @transform_2(%arg0: i32) -> (i32, i32) {
    %c0_i32 = arith.constant 0 : i32
    %c0_i32_0 = arith.constant 0 : i32
    return %arg0, %c0_i32 : i32, i32
  }
}

</mosaic_0001>

<bundles_post_ra>
// kernel: tpu_custom_call.1
= control target key start
LH: loop header
LB: loop body
LE: loop exit
PB: predicated region body
PF: predicated region fallthrough
CT: control target
= control target key end

     0   :  { %7 = vsyncpa [#allocation3], 0  ;;  %s902_s0 = inlined_call_operand.hbm [shape: f32[64,128], index: 0, kind: input, shape index: {}]   ;;  %s903_s1 = inlined_call_operand.hbm [shape: f32[520,128], index: 1, kind: input, shape index: {}]   ;;  %s904_s2 = inlined_call_operand.hbm [shape: f32[64,128], index: 2, kind: output, shape index: {}]  }
   0x1   :  { %9 = vsyncpa [#allocation3 + $0x1], 0 }
   0x2   :  { %10 = vsyncpa [#allocation6], 0 }
   0x3   :  { %11 = vsyncpa [#allocation4], 0 }
   0x4   :  { %13 = vsyncpa [#allocation4 + $0x1], 0  ;;  %s742_s9 = smov 0   ;;  %s744_s10 = smov 0  }
   0x5   :  { %s746_s11 = smov 0   ;;  %s748_s12 = smov 0  }
   0x6 LB: > { %s763_s13 = sadd.s32 4294967295, %s720_s12   ;;  %s503_s14 = sadd.s32 4294967294, %s720_s12   ;;  %s720_s12 = sphi %s748_s12, %s914_s12   ;;  %s716_s11 = sphi %s746_s11, %s913_s11   ;;  %s712_s10 = sphi %s744_s10, %s912_s10   ;;  %s708_s9 = sphi %s742_s9, %s911_s9  }
   0x7   : > { %p39_p0 = scmp.ne.s32.totalorder %s712_s10, %s708_s9  ;;  %p40_p1 = scmp.eq.s32.totalorder %s763_s13, 0 }
   0x8   : > { %p84_p2 = scmp.eq.s32.totalorder %s763_s13, 1  ;;  %p90_p3 = scmp.eq.s32.totalorder %s503_s14, 1 }
   0x9   : > { %p772_p4 = por %p40_p1, %p39_p0  ;;  %p504_p5 = scmp.ge.s32.totalorder %s720_s12, 1 }
   0xa   : > { %p777_p6 = por %p90_p3, %p39_p0  ;;  %p97_p7 = scmp.lt.s32.totalorder %s720_s12, 3 }
   0xb   : > { %s108_s19 = sshll.u32 %s903_s1, 4  ;;  %s722_s21 = smov [#allocation5]   ;;  %s109_s19 = int_to_ptr.hbm [resolvable:$true] %s108_s19 }
   0xc   : > { %p785_p8 = pnand %p504_p5, %p97_p7  ;;  %s110_s22 = sshll.u32 %s722_s21, 4  ;;  %s111_s22 = int_to_ptr.vmem [resolvable:$true] %s110_s22 }
   0xd   : > { %s795_s23 = sadd.s32 1, %s720_s12   ;;  %s723_s24 = smov 128  }
   0xe   : > { %p529_p9 = pneg %p785_p8  ;;  %s724_s25 = smov 8  }
   0xf   : > { %s23_s26 = ssub.s32 %s720_s12, %s795_s23  ;;  %s26_s27 = sadd.s32 1, %s716_s11 }
  0x10   : > { %p530_p10 = pnand %p529_p9, %p40_p1  ;;  %p24_p12 = scmp.eq.s32.totalorder %s23_s26, 0 }
  0x11   : > { %p33_p13 = scmp.ne.s32.totalorder %s716_s11, %s712_s10  ;;  %p34_p0 = scmp.eq.s32.totalorder %s720_s12, 0 }
  0x12   : > { %532 = dma.hbm_to_vmem [thread:$0]  (!%p530_p10), %s109_s19, 8320, %s111_s22, [#allocation6], %s723_s24, %s723_s24, %s724_s25  }
  0x13   : > { %s807_s28 = scalar_select %p24_p12, %s716_s11, %s26_s27  }
  0x14   : > { %p811_p3 = por %p84_p2, %p33_p13  ;;  %p542_p5 = scmp.lt.s32.totalorder %s720_s12, 2 }
  0x15   : > { %s124_s30 = sand.u32 1, %s716_s11   ;;  %s519_s3 = sshll.u32 %s720_s12, 5 }
  0x16   : > { %p35_p7 = por %p34_p0, %p33_p13  ;;  %s507_s4 = sshll.u32 %s124_s30, 5 }
  0x17   : > { %s133_s7 = scalar_lea.hbm %s902_s0, %s519_s3  ;;  %s128_s14 = scalar_lea.vmem [#allocation2], %s507_s4 }
  0x18   : > { %s134_s8 = sshll.u32 %s133_s7, 4  ;;  %s136_s17 = sshll.u32 %s128_s14, 4  ;;  %s135_s8 = int_to_ptr.hbm [resolvable:$true] %s134_s8  ;;  %s137_s17 = int_to_ptr.vmem [resolvable:$true] %s136_s17 }
  0x19   : > { %p821_p9 = pnand %p542_p5, %p35_p7  ;;  %s125_s19 = scalar_lea.sflag [#allocation3], %s124_s30 }
  0x1a   : > { %s620_s21 = sshra.s32 %s135_s8, 4  ;;  %s627_s3 = scalar_lea.hbm %s902_s0, 64  ;;  %s621_s21 = int_to_ptr.hbm [resolvable:$true] %s620_s21 }
  0x1b   : > { %s622_s22 = scalar_lea.hbm %s621_s21, 32  ;;  %p624_p10 = pneg %p821_p9 }
  0x1c   : > { %p623_p2 = scmp.ne.s32.totalorder %s621_s21, %s622_s22  ;;  %p628_p0 = scmp.lt.s32.totalorder %s621_s21, %s902_s0 }
  0x1d   : > { %p629_p5 = scmp.lt.s32.totalorder %s627_s3, %s622_s22 }
  0x1e   : > { %p625_p12 = pnand %p624_p10, %p623_p2 }
  0x1f   : > { %p630_p7 = por %p629_p5, %p628_p0 }
  0x20   : > { %p626_p13 = pneg %p625_p12 }
  0x22   : > { %p631_p11 = pnand %p630_p7, %p626_p13 }
  0x24   : > { %634 = shalt.err (!%p631_p11)
}
  0x25   : > { %536 = dma.hbm_to_vmem [thread:$0]  (!%p821_p9), %s135_s8, 512, %s137_s17, %s125_s19, %s723_s24, %s723_s24, %s724_s25  }
  0x26   : > { %148 = sbr.rel (%p785_p8) target bundleno = 649 (0x289), region = 28  ;;  %s841_s30 = sand.u32 (!%p785_p8), 1, %s712_s10  }
  0x27   : > { %s511_s6 = sshll.u32 (!%p785_p8), %s841_s30, 5  ;;  %s151_s7 = scalar_lea.sflag (!%p785_p8), [#allocation3], %s841_s30 }
  0x28   : > { %s847_s14 = scalar_lea.vmem (!%p785_p8), [#allocation2], %s511_s6 }
  0x2b   : > { %695 = dma.done.wait (%p772_p4), %s151_s7, 512  }
  0x2c   : > { %697 = vsyncadd (%p772_p4), %s151_s7, 4294966784 }
  0x2d   : > { %699 = dma.done.wait (%p40_p1), [#allocation6], 8320  }
  0x2e   : > { %701 = vsyncadd (%p40_p1), [#allocation6], 4294958976  ;;  %v203_v0 = vld [vmem:[#allocation5 + $0x78] sm:$0xff]  ;;  %v202_v1 = vld [vmem:[#allocation5 + $0x70] sm:$0xff]  ;;  %s180_s15 = scalar_lea.vmem [#allocation7], %s511_s6  ;;  %s520_s20 = sshll.u32 %s763_s13, 5 }
  0x2f   : > { %205 = vmatpush.msra.mxu0 %v203_v0  ;;  %v201_v2 = vld [vmem:[#allocation5 + $0x68] sm:$0xff]  ;;  %v200_v3 = vld [vmem:[#allocation5 + $0x60] sm:$0xff]  ;;  %v199_v4 = vld [vmem:[#allocation5 + $0x58] sm:$0xff]  ;;  %s416_s8 = scalar_lea.hbm %s904_s2, %s520_s20  ;;  %s417_s17 = sshll.u32 %s180_s15, 4  ;;  %s418_s17 = int_to_ptr.vmem [resolvable:$true] %s417_s17 }
  0x30   : > { %v198_v5 = vld [vmem:[#allocation5 + $0x50] sm:$0xff]  ;;  %v197_v6 = vld [vmem:[#allocation5 + $0x48] sm:$0xff]  ;;  %v196_v7 = vld [vmem:[#allocation5 + $0x40] sm:$0xff]  ;;  %s419_s18 = sshll.u32 %s416_s8, 4  ;;  %s405_s19 = scalar_lea.sflag [#allocation4], %s841_s30  ;;  %s420_s18 = int_to_ptr.hbm [resolvable:$true] %s419_s18 }
  0x31   : > { %206 = vmatpush.msra.mxu0 %v202_v1  ;;  %v195_v8 = vld [vmem:[#allocation5 + $0x38] sm:$0xff]  ;;  %v194_v9 = vld [vmem:[#allocation5 + $0x30] sm:$0xff]  ;;  %v193_v10 = vld [vmem:[#allocation5 + $0x28] sm:$0xff]  ;;  %s664_s21 = sshra.s32 %s420_s18, 4  ;;  %s670_s27 = scalar_lea.hbm %s904_s2, 64  ;;  %s665_s21 = int_to_ptr.hbm [resolvable:$true] %s664_s21 }
  0x32   : > { %v192_v11 = vld [vmem:[#allocation5 + $0x20] sm:$0xff]  ;;  %v191_v12 = vld [vmem:[#allocation5 + $0x18] sm:$0xff]  ;;  %v190_v13 = vld [vmem:[#allocation5 + $0x10] sm:$0xff]  ;;  %s666_s13 = scalar_lea.hbm %s665_s21, 32  ;;  %p671_p11 = scmp.lt.s32.totalorder %s665_s21, %s904_s2 }
  0x33   : > { %207 = vmatpush.msra.mxu0 %v201_v2  ;;  %v253_v14 = vld [vmem:[#allocation5 + $0xf8] sm:$0xff]  ;;  %v252_v15 = vld [vmem:[#allocation5 + $0xf0] sm:$0xff]  ;;  %v189_v16 = vld [vmem:[#allocation5 + $0x8] sm:$0xff]  ;;  %p667_p1 = scmp.ne.s32.totalorder %s665_s21, %s666_s13  ;;  %p672_p9 = scmp.lt.s32.totalorder %s670_s27, %s666_s13 }
  0x34   : > { %255 = vmatpush.msra.mxu1 %v253_v14  ;;  %v251_v17 = vld [vmem:[#allocation5 + $0xe8] sm:$0xff]  ;;  %v188_v18 = vld [vmem:[#allocation5] sm:$0xff]  ;;  %v249_v21 = vld [vmem:[#allocation5 + $0xd8] sm:$0xff] }
  0x35   : > { %208 = vmatpush.msra.mxu0 %v200_v3  ;;  %v250_v19 = vld [vmem:[#allocation5 + $0xe0] sm:$0xff]  ;;  %v248_v22 = vld [vmem:[#allocation5 + $0xd0] sm:$0xff]  ;;  %v247_v23 = vld [vmem:[#allocation5 + $0xc8] sm:$0xff]  ;;  %p668_p4 = pnand %p667_p1, %p811_p3  ;;  %p673_p2 = por %p672_p9, %p671_p11 }
  0x36   : > { %256 = vmatpush.msra.mxu1 %v252_v15  ;;  %v183_v20 = vld [vmem:[%s847_s14] sm:$0xff]  ;;  %v184_v25 = vld [vmem:[%s847_s14 + $0x8] sm:$0xff]  ;;  %v245_v26 = vld [vmem:[#allocation5 + $0xb8] sm:$0xff] }
  0x37   : > { %209 = vmatpush.msra.mxu0 %v199_v4  ;;  %v246_v24 = vld [vmem:[#allocation5 + $0xc0] sm:$0xff]  ;;  %v244_v27 = vld [vmem:[#allocation5 + $0xb0] sm:$0xff]  ;;  %v243_v28 = vld [vmem:[#allocation5 + $0xa8] sm:$0xff]  ;;  %p669_p8 = pneg %p668_p4 }
  0x38   : > { %257 = vmatpush.msra.mxu1 %v251_v17  ;;  %v242_v29 = vld [vmem:[#allocation5 + $0xa0] sm:$0xff]  ;;  %v185_v30 = vld [vmem:[%s847_s14 + $0x10] sm:$0xff]  ;;  %v241_v31 = vld [vmem:[#allocation5 + $0x98] sm:$0xff] }
  0x39   : > { %210 = vmatpush.msra.mxu0 %v198_v5  ;;  %v186_v32 = vld [vmem:[%s847_s14 + $0x18] sm:$0xff]  ;;  %v240_v33 = vld [vmem:[#allocation5 + $0x90] sm:$0xff]  ;;  %v239_v34 = vld [vmem:[#allocation5 + $0x88] sm:$0xff]  ;;  %p674_p10 = pnand %p673_p2, %p669_p8 }
  0x3a   : > { %258 = vmatpush.msra.mxu1 %v250_v19  ;;  %v238_v35 = vld [vmem:[#allocation5 + $0x80] sm:$0xff]  ;;  %v303_v38 = vld [vmem:[#allocation5 + $0x178] sm:$0xff]  ;;  %v302_v39 = vld [vmem:[#allocation5 + $0x170] sm:$0xff] }
  0x3b   : > { %211 = vmatpush.msra.mxu0 %v197_v6  ;;  %v861_v36 = vld [vmem:[#allocation5 + $0x200] sm:$0xff]  ;;  %305 = vmatpush.msra.mxu2 %v303_v38  ;;  %v301_v40 = vld [vmem:[#allocation5 + $0x168] sm:$0xff]  ;;  %v299_v45 = vld [vmem:[#allocation5 + $0x158] sm:$0xff] }
  0x3c   : > { %259 = vmatpush.msra.mxu1 %v249_v21  ;;  %v204_v37 = vperm.slane %v861_v36, 0  ;;  %v300_v43 = vld [vmem:[#allocation5 + $0x160] sm:$0xff]  ;;  %v298_v46 = vld [vmem:[#allocation5 + $0x150] sm:$0xff]  ;;  %v297_v47 = vld [vmem:[#allocation5 + $0x148] sm:$0xff]  ;;  %v254_v2 = vperm.slane %v861_v36, 1 }
  0x3d   : > { %212 = vmatpush.msra.mxu0 %v196_v7  ;;  %306 = vmatpush.msra.mxu2 %v302_v39  ;;  %v296_v50 = vld [vmem:[#allocation5 + $0x140] sm:$0xff]  ;;  %v295_v52 = vld [vmem:[#allocation5 + $0x138] sm:$0xff]  ;;  %v294_v53 = vld [vmem:[#allocation5 + $0x130] sm:$0xff] }
  0x3e   : > { %260 = vmatpush.msra.mxu1 %v248_v22  ;;  %v293_v54 = vld [vmem:[#allocation5 + $0x128] sm:$0xff]  ;;  %v292_v57 = vld [vmem:[#allocation5 + $0x120] sm:$0xff]  ;;  %v291_v59 = vld [vmem:[#allocation5 + $0x118] sm:$0xff] }
  0x3f   : > { %213 = vmatpush.msra.mxu0 %v195_v8  ;;  %307 = vmatpush.msra.mxu2 %v301_v40  ;;  %v290_v63 = vld [vmem:[#allocation5 + $0x110] sm:$0xff]  ;;  %v289_v0 = vld [vmem:[#allocation5 + $0x108] sm:$0xff]  ;;  %v288_v1 = vld [vmem:[#allocation5 + $0x100] sm:$0xff] }
  0x40   : > { %261 = vmatpush.msra.mxu1 %v247_v23  ;;  %v353_v3 = vld [vmem:[#allocation5 + $0x1f8] sm:$0xff]  ;;  %v352_v4 = vld [vmem:[#allocation5 + $0x1f0] sm:$0xff]  ;;  %v351_v5 = vld [vmem:[#allocation5 + $0x1e8] sm:$0xff] }
  0x41   : > { %214 = vmatpush.msra.mxu0 %v194_v9  ;;  %308 = vmatpush.msra.mxu2 %v300_v43  ;;  %v350_v8 = vld [vmem:[#allocation5 + $0x1e0] sm:$0xff]  ;;  %v345_v17 = vld [vmem:[#allocation5 + $0x1b8] sm:$0xff]  ;;  %v343_v19 = vld [vmem:[#allocation5 + $0x1a8] sm:$0xff] }
  0x42   : > { %262 = vmatpush.msra.mxu1 %v246_v24  ;;  %355 = vmatpush.msra.mxu3 %v353_v3  ;;  %v346_v15 = vld [vmem:[#allocation5 + $0x1c0] sm:$0xff]  ;;  %v341_v24 = vld [vmem:[#allocation5 + $0x198] sm:$0xff] }
  0x43   : > { %215 = vmatpush.msra.mxu0 %v193_v10  ;;  %309 = vmatpush.msra.mxu2 %v299_v45  ;;  %v349_v10 = vld [vmem:[#allocation5 + $0x1d8] sm:$0xff]  ;;  %v342_v22 = vld [vmem:[#allocation5 + $0x1a0] sm:$0xff]  ;;  %v354_v45 = vperm.slane %v861_v36, 3 }
  0x44   : > { %263 = vmatpush.msra.mxu1 %v245_v26  ;;  %356 = vmatpush.msra.mxu3 %v352_v4 }
  0x45   : > { %216 = vmatpush.msra.mxu0 %v192_v11  ;;  %310 = vmatpush.msra.mxu2 %v298_v46  ;;  %v348_v11 = vld [vmem:[#allocation5 + $0x1d0] sm:$0xff] }
  0x46   : > { %264 = vmatpush.msra.mxu1 %v244_v27  ;;  %357 = vmatpush.msra.mxu3 %v351_v5 }
  0x47   : > { %217 = vmatpush.msra.mxu0 %v191_v12  ;;  %311 = vmatpush.msra.mxu2 %v297_v47  ;;  %v347_v12 = vld [vmem:[#allocation5 + $0x1c8] sm:$0xff] }
  0x48   : > { %265 = vmatpush.msra.mxu1 %v243_v28  ;;  %358 = vmatpush.msra.mxu3 %v350_v8  ;;  %v340_v28 = vld [vmem:[#allocation5 + $0x190] sm:$0xff] }
  0x49   : > { %218 = vmatpush.msra.mxu0 %v190_v13  ;;  %312 = vmatpush.msra.mxu2 %v296_v50 }
  0x4a   : > { %266 = vmatpush.msra.mxu1 %v242_v29  ;;  %359 = vmatpush.msra.mxu3 %v349_v10  ;;  %v339_v29 = vld [vmem:[#allocation5 + $0x188] sm:$0xff] }
  0x4b   : > { %219 = vmatpush.msra.mxu0 %v189_v16  ;;  %313 = vmatpush.msra.mxu2 %v295_v52 }
  0x4c   : > { %267 = vmatpush.msra.mxu1 %v241_v31  ;;  %360 = vmatpush.msra.mxu3 %v348_v11  ;;  %v304_v31 = vperm.slane %v861_v36, 2 }
  0x4d   : > { %220 = vmatpush.msra.mxu0 %v188_v18  ;;  %314 = vmatpush.msra.mxu2 %v294_v53  ;;  %v344_v18 = vld [vmem:[#allocation5 + $0x1b0] sm:$0xff] }
  0x4e   : > { %221 = vmatmul.f32.vlgmr.msra.gmra.mxu0 %v183_v20  ;;  %268 = vmatpush.msra.mxu1 %v240_v33 }
  0x4f   : > { %315 = vmatpush.msra.mxu2 %v293_v54  ;;  %361 = vmatpush.msra.mxu3 %v347_v12 }
  0x50   : > { %269 = vmatpush.msra.mxu1 %v239_v34 }
  0x51   : > { %316 = vmatpush.msra.mxu2 %v292_v57  ;;  %362 = vmatpush.msra.mxu3 %v346_v15 }
  0x52   : > { %270 = vmatpush.msra.mxu1 %v238_v35 }
  0x53   : > { %317 = vmatpush.msra.mxu2 %v291_v59  ;;  %363 = vmatpush.msra.mxu3 %v345_v17 }
  0x55   : > { %318 = vmatpush.msra.mxu2 %v290_v63  ;;  %364 = vmatpush.msra.mxu3 %v344_v18 }
  0x56   : > { %224 = vmatmul.f32.gmra.mxu0 %v184_v25 }
  0x57   : > { %319 = vmatpush.msra.mxu2 %v289_v0  ;;  %365 = vmatpush.msra.mxu3 %v343_v19 }
  0x59   : > { %320 = vmatpush.msra.mxu2 %v288_v1  ;;  %366 = vmatpush.msra.mxu3 %v342_v22 }
  0x5b   : > { %367 = vmatpush.msra.mxu3 %v341_v24 }
  0x5d   : > { %368 = vmatpush.msra.mxu3 %v340_v28 }
  0x5e   : > { %227 = vmatmul.f32.gmra.mxu0 %v185_v30  ;;  %v338_v30 = vld [vmem:[#allocation5 + $0x180] sm:$0xff] }
  0x5f   : > { %369 = vmatpush.msra.mxu3 %v339_v29 }
  0x61   : > { %370 = vmatpush.msra.mxu3 %v338_v30 }
  0x66   : > { %230 = vmatmul.f32.gmra.mxu0 %v186_v32 }
  0xcb   : > { %v222_v41 = vpop.f32.mrf.mxu0 }
  0xcc   : > { %v223_v42 = vadd.f32 %v222_v41, %v204_v37 }
  0xce   : > { %v234_v44 = vmax.f32 %v223_v42, 0.0 }
  0xd0   : > { %271 = vmatmul.f32.vlgmr.msra.gmra.mxu1 %v234_v44 }
  0xd3   : > { %v225_v48 = vpop.f32.mrf.mxu0 }
  0xd4   : > { %v226_v49 = vadd.f32 %v225_v48, %v204_v37 }
  0xd6   : > { %v235_v51 = vmax.f32 %v226_v49, 0.0 }
  0xd8   : > { %274 = vmatmul.f32.gmra.mxu1 %v235_v51 }
  0xdb   : > { %v228_v55 = vpop.f32.mrf.mxu0 }
  0xdc   : > { %v229_v56 = vadd.f32 %v228_v55, %v204_v37 }
  0xde   : > { %v236_v58 = vmax.f32 %v229_v56, 0.0 }
  0xe0   : > { %277 = vmatmul.f32.gmra.mxu1 %v236_v58 }
  0xe3   : > { %v231_v60 = vpop.f32.mrf.mxu0 }
  0xe4   : > { %v232_v61 = vadd.f32 %v231_v60, %v204_v37 }
  0xe6   : > { %v237_v62 = vmax.f32 %v232_v61, 0.0 }
  0xe8   : > { %280 = vmatmul.f32.gmra.mxu1 %v237_v62 }
 0x14d   : > { %v272_v6 = vpop.f32.mrf.mxu1 }
 0x14e   : > { %v273_v7 = vadd.f32 %v272_v6, %v254_v2 }
 0x150   : > { %v284_v9 = vmax.f32 %v273_v7, 0.0 }
 0x152   : > { %321 = vmatmul.f32.vlgmr.msra.gmra.mxu2 %v284_v9 }
 0x155   : > { %v275_v13 = vpop.f32.mrf.mxu1 }
 0x156   : > { %v276_v14 = vadd.f32 %v275_v13, %v254_v2 }
 0x158   : > { %v285_v16 = vmax.f32 %v276_v14, 0.0 }
 0x15a   : > { %324 = vmatmul.f32.gmra.mxu2 %v285_v16 }
 0x15d   : > { %v278_v20 = vpop.f32.mrf.mxu1 }
 0x15e   : > { %v279_v21 = vadd.f32 %v278_v20, %v254_v2 }
 0x160   : > { %v286_v23 = vmax.f32 %v279_v21, 0.0 }
 0x162   : > { %327 = vmatmul.f32.gmra.mxu2 %v286_v23 }
 0x165   : > { %v281_v25 = vpop.f32.mrf.mxu1 }
 0x166   : > { %v282_v26 = vadd.f32 %v281_v25, %v254_v2 }
 0x168   : > { %v287_v27 = vmax.f32 %v282_v26, 0.0 }
 0x16a   : > { %330 = vmatmul.f32.gmra.mxu2 %v287_v27 }
 0x1d5   : > { %v322_v32 = vpop.f32.mrf.mxu2 }
 0x1d6   : > { %v323_v33 = vadd.f32 %v322_v32, %v304_v31 }
 0x1d8   : > { %v334_v34 = vmax.f32 %v323_v33, 0.0 }
 0x1da   : > { %371 = vmatmul.f32.vlgmr.msra.gmra.mxu3 %v334_v34 }
 0x1dd   : > { %v325_v35 = vpop.f32.mrf.mxu2 }
 0x1de   : > { %v326_v37 = vadd.f32 %v325_v35, %v304_v31 }
 0x1e0   : > { %v335_v38 = vmax.f32 %v326_v37, 0.0 }
 0x1e2   : > { %374 = vmatmul.f32.gmra.mxu3 %v335_v38 }
 0x1e5   : > { %v328_v39 = vpop.f32.mrf.mxu2 }
 0x1e6   : > { %v329_v40 = vadd.f32 %v328_v39, %v304_v31 }
 0x1e8   : > { %v336_v41 = vmax.f32 %v329_v40, 0.0 }
 0x1ea   : > { %377 = vmatmul.f32.gmra.mxu3 %v336_v41 }
 0x1ed   : > { %v331_v42 = vpop.f32.mrf.mxu2 }
 0x1ee   : > { %v332_v43 = vadd.f32 %v331_v42, %v304_v31 }
 0x1f0   : > { %v337_v44 = vmax.f32 %v332_v43, 0.0 }
 0x1f2   : > { %380 = vmatmul.f32.gmra.mxu3 %v337_v44 }
 0x25d   : > { %v372_v46 = vpop.f32.mrf.mxu3 }
 0x25e   : > { %v373_v47 = vadd.f32 %v372_v46, %v354_v45 }
 0x260   : > { %v384_v48 = vmul.f32 0.5, %v373_v47 }
 0x262   : > { %582 = vtanh.f32 %v384_v48 }
 0x265   : > { %v375_v49 = vpop.f32.mrf.mxu3 }
 0x266   : > { %v376_v50 = vadd.f32 %v375_v49, %v354_v45 }
 0x268   : > { %v583_v51 = vpop.eup %582  ;;  %v385_v52 = vmul.f32 0.5, %v376_v50 }
 0x269   : > { %v392_v53 = vadd.f32 1.0, %v583_v51 }
 0x26a   : > { %584 = vtanh.f32 %v385_v52 }
 0x26b   : > { %v396_v54 = vmul.f32 0.5, %v392_v53 }
 0x26d   : > { %400 = vst [vmem:[%s180_s15] sm:$0xff] %v396_v54  ;;  %v378_v55 = vpop.f32.mrf.mxu3 }
 0x26e   : > { %v379_v56 = vadd.f32 %v378_v55, %v354_v45 }
 0x270   : > { %v585_v57 = vpop.eup %584  ;;  %v386_v58 = vmul.f32 0.5, %v379_v56 }
 0x271   : > { %v393_v36 = vadd.f32 1.0, %v585_v57 }
 0x272   : > { %586 = vtanh.f32 %v386_v58 }
 0x273   : > { %v397_v59 = vmul.f32 0.5, %v393_v36 }
 0x275   : > { %401 = vst [vmem:[%s180_s15 + $0x8] sm:$0xff] %v397_v59  ;;  %v381_v60 = vpop.f32.mrf.mxu3 }
 0x276   : > { %v382_v61 = vadd.f32 %v381_v60, %v354_v45 }
 0x278   : > { %v587_v62 = vpop.eup %586  ;;  %v387_v63 = vmul.f32 0.5, %v382_v61 }
 0x279   : > { %v394_v0 = vadd.f32 1.0, %v587_v62 }
 0x27a   : > { %588 = vtanh.f32 %v387_v63 }
 0x27b   : > { %v398_v1 = vmul.f32 0.5, %v394_v0 }
 0x27d   : > { %402 = vst [vmem:[%s180_s15 + $0x10] sm:$0xff] %v398_v1 }
 0x280   : > { %v589_v2 = vpop.eup %588 }
 0x281   : > { %v395_v3 = vadd.f32 1.0, %v589_v2 }
 0x283   : > { %v399_v4 = vmul.f32 0.5, %v395_v3 }
 0x285   : > { %403 = vst [vmem:[%s180_s15 + $0x18] sm:$0xff] %v399_v4 }
 0x286   : > { %677 = shalt.err (!%p674_p10)
}
 0x287   : > { %s725_s5 = smov 128   ;;  %s726_s30 = smov 8  }
 0x288   : > { %527 = dma.vmem_to_hbm [thread:$0]  (%p811_p3), %s418_s17, 512, %s420_s18, %s405_s19, %s725_s5, %s725_s5, %s726_s30  }
 0x289 PF: > { %s434_s6 = sand.u32 1, %s708_s9   ;;  %p910_p12 = scmp.ge.s32.totalorder %s720_s12, 2 }
 0x28a   : > { %s435_s7 = scalar_lea.sflag [#allocation4], %s434_s6 }
 0x28b   : > { %p538_p13 = pnand %p910_p12, %p777_p6 }
 0x28d   : > { %p539_p0 = pneg %p538_p13 }
 0x28f   : > { %703 = dma.done.wait (%p539_p0), %s435_s7, 512  }
 0x290   : > { %705 = vsyncadd (%p539_p0), %s435_s7, 4294966784  ;;  %p16_p5 = scmp.ge.s32.totalorder %s795_s23, 4   ;;  %s911_s9 = smov %s712_s10 }
 0x291   : > { %s912_s10 = smov %s716_s11  ;;  %s913_s11 = smov %s807_s28 }
 0x292   : > { %s914_s12 = smov %s795_s23  ;;  %18 = sbr.rel (!%p16_p5) target bundleno = 6 (0x6), region = 77 }
 0x297   :  { %441 = vsyncpa [#allocation3], 1 }
 0x298   :  { %443 = vsyncpa [#allocation3 + $0x1], 1 }
 0x299   :  { %444 = vsyncpa [#allocation6], 1 }
 0x29a   :  { %445 = vsyncpa [#allocation4], 1 }
 0x29b   :  { %447 = vsyncpa [#allocation4 + $0x1], 1 }

</bundles_post_ra>
